<compile_context>
chip_gen: v7x
topology: tpu7x:2x2x1
jax: 0.10.0
libtpu: 0.0.40
codegen_flags: <defaults>
</compile_context>

<pallas_src>
import functools
import math

import jax
import jax.numpy as jnp
from jax.experimental import pallas as pl
from jax.experimental.pallas import tpu as pltpu


def _round_up(x, m):
    return ((x + m - 1) // m) * m


def _tensorcores_per_chip():
    """Tiling hint: v7x exposes 2 TensorCores per chip, earlier gens 1."""
    try:
        kind = jax.devices()[0].device_kind.lower()
    except Exception:
        return 1
    return 2 if ("v7" in kind or "7x" in kind) else 1


def _is_pre_v6():
    """v5e and older lack bf16 VPU/EUP -> keep the elementwise chain in f32 there."""
    try:
        kind = jax.devices()[0].device_kind.lower()
    except Exception:
        return False
    return any(tag in kind for tag in ("v2", "v3", "v4", "v5"))


def _mlp_kernel(n_layers, ew_dtype, *refs):
    """Fused MLP forward (eval-mode BN already folded into W/b).

    refs layout:
      refs[0]             : x tile      (TB, D_in)              (param dtype)
      refs[1 : 1+n]       : weights W_i (Dpad_{i-1}, Dpad_i)    (param dtype)
      refs[1+n : 1+2n]    : biases  b_i (1, Dpad_i)             (f32, BN folded)
      refs[-1]            : output tile (TB, Dpad_out)          (f32)
    """
    n = n_layers
    x_ref = refs[0]
    w_refs = refs[1:1 + n]
    b_refs = refs[1 + n:1 + 2 * n]
    o_ref = refs[-1]

    mm_dtype = w_refs[0].dtype            # MXU operand dtype (bf16 or f32)
    h = x_ref[...]
    for i in range(n):
        acc = jnp.dot(h.astype(mm_dtype), w_refs[i][...],
                      preferred_element_type=jnp.float32)   # f32 accumulation
        acc = acc + b_refs[i][...]                          # f32 bias (BN folded in)
        if i < n - 1:
            # Hidden layer: (folded eval-mode BN) + Tanh.
            # Tanh runs in bf16 on v6e/v7x (bf16 EUP), f32 on v5e.
            h = jnp.tanh(acc.astype(ew_dtype))
            # TODO(synk): training-mode Dropout(0.5) omitted (eval => identity).
        else:
            o_ref[...] = acc.astype(o_ref.dtype)


def _fold_and_pad_params(weights, biases, bn_scales, bn_shifts, d_in, param_dtype):
    """Fold eval-mode BN into each hidden Linear, then pad feature dims.

    Only the *output* feature dim of each layer is padded to a lane-dense
    multiple of 128.  The K dim of the first layer stays at the true d_in
    (a block dim equal to the full array dim is exempt from the (8,128) rule),
    which avoids an extra HBM round trip padding x's feature axis.
    """
    n = len(weights)
    dims = [d_in] + [w.shape[1] for w in weights]
    dims_pad = [d_in] + [_round_up(d, 128) for d in dims[1:]]

    w_pad, b_pad = [], []
    for i in range(n):
        w = jnp.asarray(weights[i], jnp.float32)
        b = jnp.asarray(biases[i], jnp.float32)
        if i < n - 1:
            # y = (x@W + b) * s + t  ==  x @ (W*s) + (b*s + t)   (fold in f32)
            w = w * bn_scales[i]
            b = b * bn_scales[i] + bn_shifts[i]
        wp = jnp.zeros((dims_pad[i], dims_pad[i + 1]), jnp.float32)
        wp = wp.at[:dims[i], :dims[i + 1]].set(w)
        bp = jnp.zeros((1, dims_pad[i + 1]), jnp.float32)
        bp = bp.at[:, :dims[i + 1]].set(b)
        w_pad.append(wp.astype(param_dtype))  # bf16 weights: MXU-native on v5e/v6e/v7x
        b_pad.append(bp)                      # biases stay f32
    return w_pad, b_pad, dims_pad


def mlp_pallas(x, weights, biases, bn_scales, bn_shifts, *,
               batch_tile=None, param_dtype=jnp.bfloat16, ew_dtype=None):
    """Run the fused MLP Pallas kernel (eval-mode semantics only).

    x:         (B, D_in) float32
    weights:   list of (D_{i-1}, D_i) arrays (PyTorch weights transposed)
    biases:    list of (1, D_i) arrays
    bn_scales: list of (1, D_i) arrays for hidden layers (gamma / sqrt(var + eps))
    bn_shifts: list of (1, D_i) arrays for hidden layers (beta - mean * scale)
    """
    n_layers = len(weights)
    B, d_in = x.shape
    d_out = weights[-1].shape[1]

    param_dtype = jnp.dtype(param_dtype)
    if ew_dtype is None:
        # bf16 tanh/elementwise chain on v6e/v7x; f32 on v5e and for f32 params.
        ew_dtype = (jnp.float32
                    if (param_dtype == jnp.dtype(jnp.float32) or _is_pre_v6())
                    else jnp.bfloat16)

    w_p, b_p, dims_pad = _fold_and_pad_params(
        weights, biases, bn_scales, bn_shifts, d_in, param_dtype)
    d_out_pad = dims_pad[-1]

    # ---- batch tiling: remainder-aware + chip-aware -------------------------
    n_tc = _tensorcores_per_chip()
    if batch_tile is None:
        if B < 128 * n_tc:
            # Small batch: one fat grid step; ~0.35us/step pipeline overhead
            # dominates anything gained by splitting.
            n_tiles = 1
        else:
            # ~<=512-row tiles, at least one tile per TensorCore (v7x: >=2
            # "parallel" steps so both TCs get work).  cdiv-based so B_pad
            # overshoots by less than one tile even for ragged B.
            n_tiles = max(n_tc, -(-B // 512))
        batch_tile = _round_up(-(-B // n_tiles), 8)
    B_pad = _round_up(B, batch_tile)

    # Activations stream in the matmul-operand dtype (halves x DMA bytes when
    # bf16); accumulation / bias / output stay f32.  Feature axis NOT padded.
    x_p = jnp.pad(x, ((0, B_pad - B), (0, 0))).astype(param_dtype)

    kernel = functools.partial(_mlp_kernel, n_layers, ew_dtype)

    x_spec = pl.BlockSpec((batch_tile, d_in), lambda i: (i, 0))
    out_spec = pl.BlockSpec((batch_tile, d_out_pad), lambda i: (i, 0))

    # ---- explicit VMEM budget (v7x: 64 MiB physical / 32 MiB scoped default,
    #      v5e scoped default is only 16 MiB) ---------------------------------
    # Resident-weight bound: every (folded, padded) W/b stays in VMEM for all
    # grid steps (constant index_map, single-buffered when Buffered(1) is
    # available), plus double-buffered x/out tiles and f32 intermediates.
    # If hidden sizes ever exceed this budget, add a second grid axis tiling
    # the largest W over its output (N) dimension (256-wide tiles on v6e/v7x,
    # 128 on v5e).
    param_bytes = (sum(int(w.size) * w.dtype.itemsize for w in w_p)
                   + sum(int(b.size) * 4 for b in b_p))
    act_bytes = 2 * batch_tile * (d_in * param_dtype.itemsize + d_out_pad * 4)
    tmp_bytes = 4 * batch_tile * max(dims_pad) * 4
    need = 2 * param_bytes + act_bytes + tmp_bytes      # worst case: dbl-buffered params
    vmem_limit = int(min(max(32 << 20, 2 * need), 56 << 20))

    def _run(single_buffer_params):
        if single_buffer_params:
            # Constant index_map -> the pipeline never re-DMAs these blocks;
            # Buffered(1) drops the useless second buffer (halves param VMEM).
            def mk(p):
                return pl.BlockSpec(p.shape, lambda i: (0, 0),
                                    pipeline_mode=pl.Buffered(1))
        else:
            def mk(p):
                return pl.BlockSpec(p.shape, lambda i: (0, 0))
        param_specs = [mk(p) for p in (*w_p, *b_p)]
        call = pl.pallas_call(
            kernel,
            out_shape=jax.ShapeDtypeStruct((B_pad, d_out_pad), jnp.float32),
            grid_spec=pltpu.PrefetchScalarGridSpec(
                num_scalar_prefetch=0,
                grid=(B_pad // batch_tile,),
                in_specs=[x_spec] + param_specs,
                out_specs=out_spec,
            ),
            compiler_params=pltpu.CompilerParams(
                dimension_semantics=("parallel",),
                vmem_limit_bytes=vmem_limit),
        )
        return call(x_p, *w_p, *b_p)

    try:
        out_padded = _run(True)
    except Exception:
        # TODO(synk): pipeline_mode=pl.Buffered(1) not supported by this JAX
        # build; fall back to default double-buffered parameter blocks.
        out_padded = _run(False)

    return out_padded[:B, :d_out].astype(x.dtype)


def init_mlp_params(key, input_size, hidden_sizes, output_size):
    """Init mimicking PyTorch Linear defaults; BN with non-trivial running stats
    so that the eval-mode fold is actually exercised."""
    dims = [input_size] + list(hidden_sizes) + [output_size]
    weights, biases = [], []
    for i in range(len(dims) - 1):
        key, kw, kb = jax.random.split(key, 3)
        bound = 1.0 / math.sqrt(dims[i])
        weights.append(jax.random.uniform(kw, (dims[i], dims[i + 1]), jnp.float32,
                                          minval=-bound, maxval=bound))
        biases.append(jax.random.uniform(kb, (1, dims[i + 1]), jnp.float32,
                                         minval=-bound, maxval=bound))

    # Eval-mode BatchNorm1d folded into per-feature scale/shift.
    eps = 1e-5
    bn_scales, bn_shifts = [], []
    for h in hidden_sizes:
        key, k1, k2, k3, k4 = jax.random.split(key, 5)
        gamma = 1.0 + 0.1 * jax.random.normal(k1, (1, h), jnp.float32)
        beta = 0.1 * jax.random.normal(k2, (1, h), jnp.float32)
        running_mean = 0.1 * jax.random.normal(k3, (1, h), jnp.float32)
        running_var = 1.0 + 0.1 * jax.random.uniform(k4, (1, h), jnp.float32)
        scale = gamma / jnp.sqrt(running_var + eps)
        shift = beta - running_mean * scale
        bn_scales.append(scale)
        bn_shifts.append(shift)
    return weights, biases, bn_scales, bn_shifts


def mlp_reference(x, weights, biases, bn_scales, bn_shifts):
    """Plain-JAX reference (un-folded, un-padded) matching the PyTorch module in eval mode."""
    n = len(weights)
    h = x
    for i in range(n):
        h = h @ weights[i] + biases[i]
        if i < n - 1:
            h = h * bn_scales[i] + bn_shifts[i]
            h = jnp.tanh(h)
    return h


if __name__ == "__main__":
    key = jax.random.PRNGKey(0)

    # Small shapes consistent with the module: MLP(input_size=16,
    # hidden_sizes=[32, 32], output_size=4), batch = 16.
    input_size, hidden_sizes, output_size = 16, [32, 32], 4
    B = 16

    key, kx = jax.random.split(key)
    x = jax.random.normal(kx, (B, input_size), jnp.float32)

    weights, biases, bn_scales, bn_shifts = init_mlp_params(
        key, input_size, hidden_sizes, output_size)

    ref = mlp_reference(x, weights, biases, bn_scales, bn_shifts)

    # f32 matmul path (exact vs reference).
    out_f32 = mlp_pallas(x, weights, biases, bn_scales, bn_shifts,
                         param_dtype=jnp.float32)
    out_f32 = jax.block_until_ready(out_f32)
    assert out_f32.shape == (B, output_size)
    assert jnp.allclose(out_f32, ref, atol=1e-5, rtol=1e-5), "f32 mismatch vs reference"

    # Default path: bf16 weights/activations (MXU-native on v5e/v6e/v7x, half the
    # DMA bytes), f32 accumulation + bias; bf16 tanh on v6e/v7x, f32 on v5e.
    out_bf16 = mlp_pallas(x, weights, biases, bn_scales, bn_shifts)
    out_bf16 = jax.block_until_ready(out_bf16)
    assert out_bf16.shape == (B, output_size)
    rel_err = float(jnp.max(jnp.abs(out_bf16 - ref)) / (jnp.max(jnp.abs(ref)) + 1e-6))
    assert rel_err < 2.5e-2, f"bf16 relative error too large: {rel_err}"

    print("KERNEL_OK")
</pallas_src>

<mosaic_0001>
module attributes {stable_mosaic.version = 11 : i64} {
  func.func @_mlp_kernel(%arg0: i32, %arg1: memref<16x16xf32, #tpu.memory_space<vmem>>, %arg2: memref<16x128xf32, #tpu.memory_space<vmem>>, %arg3: memref<128x128xf32, #tpu.memory_space<vmem>>, %arg4: memref<128x128xf32, #tpu.memory_space<vmem>>, %arg5: memref<1x128xf32, #tpu.memory_space<vmem>>, %arg6: memref<1x128xf32, #tpu.memory_space<vmem>>, %arg7: memref<1x128xf32, #tpu.memory_space<vmem>>, %arg8: memref<16x128xf32, #tpu.memory_space<vmem>>) attributes {dimension_semantics = [#tpu.dimension_semantics<parallel>], iteration_bounds = array<i64: 1>, scalar_prefetch = 0 : i64, scratch_operands = 0 : i64, tpu.core_type = #tpu.core_type<tc>, window_params = [{transform_indices = @transform_0, window_bounds = array<i64: 16, 16>}, {pipeline_mode = #tpu.pipeline_mode<synchronous>, transform_indices = @transform_1, window_bounds = array<i64: 16, 128>}, {pipeline_mode = #tpu.pipeline_mode<synchronous>, transform_indices = @transform_2, window_bounds = array<i64: 128, 128>}, {pipeline_mode = #tpu.pipeline_mode<synchronous>, transform_indices = @transform_3, window_bounds = array<i64: 128, 128>}, {pipeline_mode = #tpu.pipeline_mode<synchronous>, transform_indices = @transform_4, window_bounds = array<i64: 1, 128>}, {pipeline_mode = #tpu.pipeline_mode<synchronous>, transform_indices = @transform_5, window_bounds = array<i64: 1, 128>}, {pipeline_mode = #tpu.pipeline_mode<synchronous>, transform_indices = @transform_6, window_bounds = array<i64: 1, 128>}, {transform_indices = @transform_7, window_bounds = array<i64: 16, 128>}]} {
    %c0 = arith.constant 0 : index
    %c0_0 = arith.constant 0 : index
    %0 = vector.load %arg1[%c0, %c0_0] : memref<16x16xf32, #tpu.memory_space<vmem>>, vector<16x16xf32>
    %c0_1 = arith.constant 0 : index
    %c0_2 = arith.constant 0 : index
    %1 = vector.load %arg2[%c0_1, %c0_2] : memref<16x128xf32, #tpu.memory_space<vmem>>, vector<16x128xf32>
    %cst = arith.constant dense<0.000000e+00> : vector<16x128xf32>
    %2 = tpu.matmul %0, %1, %cst {dimension_numbers = #tpu.dot_dimension_numbers<[1], [0], [0], [1], [0, 0, 1, 1], [], []>} : vector<16x16xf32>, vector<16x128xf32>, vector<16x128xf32> -> vector<16x128xf32>
    %c0_3 = arith.constant 0 : index
    %c0_4 = arith.constant 0 : index
    %3 = vector.load %arg5[%c0_3, %c0_4] : memref<1x128xf32, #tpu.memory_space<vmem>>, vector<1x128xf32>
    %4 = vector.broadcast %3 : vector<1x128xf32> to vector<16x128xf32>
    %5 = arith.addf %2, %4 : vector<16x128xf32>
    %6 = math.tanh %5 : vector<16x128xf32>
    %c0_5 = arith.constant 0 : index
    %c0_6 = arith.constant 0 : index
    %7 = vector.load %arg3[%c0_5, %c0_6] : memref<128x128xf32, #tpu.memory_space<vmem>>, vector<128x128xf32>
    %cst_7 = arith.constant dense<0.000000e+00> : vector<16x128xf32>
    %8 = tpu.matmul %6, %7, %cst_7 {dimension_numbers = #tpu.dot_dimension_numbers<[1], [0], [0], [1], [0, 0, 1, 1], [], []>} : vector<16x128xf32>, vector<128x128xf32>, vector<16x128xf32> -> vector<16x128xf32>
    %c0_8 = arith.constant 0 : index
    %c0_9 = arith.constant 0 : index
    %9 = vector.load %arg6[%c0_8, %c0_9] : memref<1x128xf32, #tpu.memory_space<vmem>>, vector<1x128xf32>
    %10 = vector.broadcast %9 : vector<1x128xf32> to vector<16x128xf32>
    %11 = arith.addf %8, %10 : vector<16x128xf32>
    %12 = math.tanh %11 : vector<16x128xf32>
    %c0_10 = arith.constant 0 : index
    %c0_11 = arith.constant 0 : index
    %13 = vector.load %arg4[%c0_10, %c0_11] : memref<128x128xf32, #tpu.memory_space<vmem>>, vector<128x128xf32>
    %cst_12 = arith.constant dense<0.000000e+00> : vector<16x128xf32>
    %14 = tpu.matmul %12, %13, %cst_12 {dimension_numbers = #tpu.dot_dimension_numbers<[1], [0], [0], [1], [0, 0, 1, 1], [], []>} : vector<16x128xf32>, vector<128x128xf32>, vector<16x128xf32> -> vector<16x128xf32>
    %c0_13 = arith.constant 0 : index
    %c0_14 = arith.constant 0 : index
    %15 = vector.load %arg7[%c0_13, %c0_14] : memref<1x128xf32, #tpu.memory_space<vmem>>, vector<1x128xf32>
    %16 = vector.broadcast %15 : vector<1x128xf32> to vector<16x128xf32>
    %17 = arith.addf %14, %16 : vector<16x128xf32>
    %c0_15 = arith.constant 0 : index
    %c0_16 = arith.constant 0 : index
    %18 = vector.load %arg8[%c0_15, %c0_16] : memref<16x128xf32, #tpu.memory_space<vmem>>, vector<16x128xf32>
    tpu.vector_store %arg8[%c0_15, %c0_16], %17 {strides = array<i32>} : memref<16x128xf32, #tpu.memory_space<vmem>>, vector<16x128xf32>,
    return
  }
  func.func @transform_0(%arg0: i32) -> (i32, i32) {
    %c0_i32 = arith.constant 0 : i32
    %c0_i32_0 = arith.constant 0 : i32
    return %arg0, %c0_i32 : i32, i32
  }
  func.func @transform_1(%arg0: i32) -> (i32, i32) {
    %c0_i32 = arith.constant 0 : i32
    %c0_i32_0 = arith.constant 0 : i32
    %c0_i32_1 = arith.constant 0 : i32
    return %c0_i32, %c0_i32_0 : i32, i32
  }
  func.func @transform_2(%arg0: i32) -> (i32, i32) {
    %c0_i32 = arith.constant 0 : i32
    %c0_i32_0 = arith.constant 0 : i32
    %c0_i32_1 = arith.constant 0 : i32
    return %c0_i32, %c0_i32_0 : i32, i32
  }
  func.func @transform_3(%arg0: i32) -> (i32, i32) {
    %c0_i32 = arith.constant 0 : i32
    %c0_i32_0 = arith.constant 0 : i32
    %c0_i32_1 = arith.constant 0 : i32
    return %c0_i32, %c0_i32_0 : i32, i32
  }
  func.func @transform_4(%arg0: i32) -> (i32, i32) {
    %c0_i32 = arith.constant 0 : i32
    %c0_i32_0 = arith.constant 0 : i32
    %c0_i32_1 = arith.constant 0 : i32
    return %c0_i32, %c0_i32_0 : i32, i32
  }
  func.func @transform_5(%arg0: i32) -> (i32, i32) {
    %c0_i32 = arith.constant 0 : i32
    %c0_i32_0 = arith.constant 0 : i32
    %c0_i32_1 = arith.constant 0 : i32
    return %c0_i32, %c0_i32_0 : i32, i32
  }
  func.func @transform_6(%arg0: i32) -> (i32, i32) {
    %c0_i32 = arith.constant 0 : i32
    %c0_i32_0 = arith.constant 0 : i32
    %c0_i32_1 = arith.constant 0 : i32
    return %c0_i32, %c0_i32_0 : i32, i32
  }
  func.func @transform_7(%arg0: i32) -> (i32, i32) {
    %c0_i32 = arith.constant 0 : i32
    %c0_i32_0 = arith.constant 0 : i32
    return %arg0, %c0_i32 : i32, i32
  }
}

module attributes {stable_mosaic.version = 11 : i64} {
  func.func @_mlp_kernel(%arg0: i32, %arg1: memref<16x16xf32, #tpu.memory_space<vmem>>, %arg2: memref<16x128xf32, #tpu.memory_space<vmem>>, %arg3: memref<128x128xf32, #tpu.memory_space<vmem>>, %arg4: memref<128x128xf32, #tpu.memory_space<vmem>>, %arg5: memref<1x128xf32, #tpu.memory_space<vmem>>, %arg6: memref<1x128xf32, #tpu.memory_space<vmem>>, %arg7: memref<1x128xf32, #tpu.memory_space<vmem>>, %arg8: memref<16x128xf32, #tpu.memory_space<vmem>>) attributes {dimension_semantics = [#tpu.dimension_semantics<parallel>], iteration_bounds = array<i64: 1>, scalar_prefetch = 0 : i64, scratch_operands = 0 : i64, tpu.core_type = #tpu.core_type<tc>, window_params = [{transform_indices = @transform_0, window_bounds = array<i64: 16, 16>}, {pipeline_mode = #tpu.pipeline_mode<synchronous>, transform_indices = @transform_1, window_bounds = array<i64: 16, 128>}, {pipeline_mode = #tpu.pipeline_mode<synchronous>, transform_indices = @transform_2, window_bounds = array<i64: 128, 128>}, {pipeline_mode = #tpu.pipeline_mode<synchronous>, transform_indices = @transform_3, window_bounds = array<i64: 128, 128>}, {pipeline_mode = #tpu.pipeline_mode<synchronous>, transform_indices = @transform_4, window_bounds = array<i64: 1, 128>}, {pipeline_mode = #tpu.pipeline_mode<synchronous>, transform_indices = @transform_5, window_bounds = array<i64: 1, 128>}, {pipeline_mode = #tpu.pipeline_mode<synchronous>, transform_indices = @transform_6, window_bounds = array<i64: 1, 128>}, {transform_indices = @transform_7, window_bounds = array<i64: 16, 128>}]} {
    %c0 = arith.constant 0 : index
    %c0_0 = arith.constant 0 : index
    %0 = vector.load %arg1[%c0, %c0_0] : memref<16x16xf32, #tpu.memory_space<vmem>>, vector<16x16xf32>
    %c0_1 = arith.constant 0 : index
    %c0_2 = arith.constant 0 : index
    %1 = vector.load %arg2[%c0_1, %c0_2] : memref<16x128xf32, #tpu.memory_space<vmem>>, vector<16x128xf32>
    %cst = arith.constant dense<0.000000e+00> : vector<16x128xf32>
    %2 = tpu.matmul %0, %1, %cst {dimension_numbers = #tpu.dot_dimension_numbers<[1], [0], [0], [1], [0, 0, 1, 1], [], []>} : vector<16x16xf32>, vector<16x128xf32>, vector<16x128xf32> -> vector<16x128xf32>
    %c0_3 = arith.constant 0 : index
    %c0_4 = arith.constant 0 : index
    %3 = vector.load %arg5[%c0_3, %c0_4] : memref<1x128xf32, #tpu.memory_space<vmem>>, vector<1x128xf32>
    %4 = vector.broadcast %3 : vector<1x128xf32> to vector<16x128xf32>
    %5 = arith.addf %2, %4 : vector<16x128xf32>
    %6 = math.tanh %5 : vector<16x128xf32>
    %c0_5 = arith.constant 0 : index
    %c0_6 = arith.constant 0 : index
    %7 = vector.load %arg3[%c0_5, %c0_6] : memref<128x128xf32, #tpu.memory_space<vmem>>, vector<128x128xf32>
    %cst_7 = arith.constant dense<0.000000e+00> : vector<16x128xf32>
    %8 = tpu.matmul %6, %7, %cst_7 {dimension_numbers = #tpu.dot_dimension_numbers<[1], [0], [0], [1], [0, 0, 1, 1], [], []>} : vector<16x128xf32>, vector<128x128xf32>, vector<16x128xf32> -> vector<16x128xf32>
    %c0_8 = arith.constant 0 : index
    %c0_9 = arith.constant 0 : index
    %9 = vector.load %arg6[%c0_8, %c0_9] : memref<1x128xf32, #tpu.memory_space<vmem>>, vector<1x128xf32>
    %10 = vector.broadcast %9 : vector<1x128xf32> to vector<16x128xf32>
    %11 = arith.addf %8, %10 : vector<16x128xf32>
    %12 = math.tanh %11 : vector<16x128xf32>
    %c0_10 = arith.constant 0 : index
    %c0_11 = arith.constant 0 : index
    %13 = vector.load %arg4[%c0_10, %c0_11] : memref<128x128xf32, #tpu.memory_space<vmem>>, vector<128x128xf32>
    %cst_12 = arith.constant dense<0.000000e+00> : vector<16x128xf32>
    %14 = tpu.matmul %12, %13, %cst_12 {dimension_numbers = #tpu.dot_dimension_numbers<[1], [0], [0], [1], [0, 0, 1, 1], [], []>} : vector<16x128xf32>, vector<128x128xf32>, vector<16x128xf32> -> vector<16x128xf32>
    %c0_13 = arith.constant 0 : index
    %c0_14 = arith.constant 0 : index
    %15 = vector.load %arg7[%c0_13, %c0_14] : memref<1x128xf32, #tpu.memory_space<vmem>>, vector<1x128xf32>
    %16 = vector.broadcast %15 : vector<1x128xf32> to vector<16x128xf32>
    %17 = arith.addf %14, %16 : vector<16x128xf32>
    %c0_15 = arith.constant 0 : index
    %c0_16 = arith.constant 0 : index
    %18 = vector.load %arg8[%c0_15, %c0_16] : memref<16x128xf32, #tpu.memory_space<vmem>>, vector<16x128xf32>
    tpu.vector_store %arg8[%c0_15, %c0_16], %17 {strides = array<i32>} : memref<16x128xf32, #tpu.memory_space<vmem>>, vector<16x128xf32>,
    return
  }
  func.func @transform_0(%arg0: i32) -> (i32, i32) {
    %c0_i32 = arith.constant 0 : i32
    %c0_i32_0 = arith.constant 0 : i32
    return %arg0, %c0_i32 : i32, i32
  }
  func.func @transform_1(%arg0: i32) -> (i32, i32) {
    %c0_i32 = arith.constant 0 : i32
    %c0_i32_0 = arith.constant 0 : i32
    %c0_i32_1 = arith.constant 0 : i32
    return %c0_i32, %c0_i32_0 : i32, i32
  }
  func.func @transform_2(%arg0: i32) -> (i32, i32) {
    %c0_i32 = arith.constant 0 : i32
    %c0_i32_0 = arith.constant 0 : i32
    %c0_i32_1 = arith.constant 0 : i32
    return %c0_i32, %c0_i32_0 : i32, i32
  }
  func.func @transform_3(%arg0: i32) -> (i32, i32) {
    %c0_i32 = arith.constant 0 : i32
    %c0_i32_0 = arith.constant 0 : i32
    %c0_i32_1 = arith.constant 0 : i32
    return %c0_i32, %c0_i32_0 : i32, i32
  }
  func.func @transform_4(%arg0: i32) -> (i32, i32) {
    %c0_i32 = arith.constant 0 : i32
    %c0_i32_0 = arith.constant 0 : i32
    %c0_i32_1 = arith.constant 0 : i32
    return %c0_i32, %c0_i32_0 : i32, i32
  }
  func.func @transform_5(%arg0: i32) -> (i32, i32) {
    %c0_i32 = arith.constant 0 : i32
    %c0_i32_0 = arith.constant 0 : i32
    %c0_i32_1 = arith.constant 0 : i32
    return %c0_i32, %c0_i32_0 : i32, i32
  }
  func.func @transform_6(%arg0: i32) -> (i32, i32) {
    %c0_i32 = arith.constant 0 : i32
    %c0_i32_0 = arith.constant 0 : i32
    %c0_i32_1 = arith.constant 0 : i32
    return %c0_i32, %c0_i32_0 : i32, i32
  }
  func.func @transform_7(%arg0: i32) -> (i32, i32) {
    %c0_i32 = arith.constant 0 : i32
    %c0_i32_0 = arith.constant 0 : i32
    return %arg0, %c0_i32 : i32, i32
  }
}

</mosaic_0001>

<bundles_post_ra>
// kernel: tpu_custom_call.1
= control target key start
LH: loop header
LB: loop body
LE: loop exit
PB: predicated region body
PF: predicated region fallthrough
CT: control target
= control target key end

     0   :  { %12 = vsyncpa [#allocation3], 0  ;;  %s866_s0 = inlined_call_operand.hbm [shape: f32[16,16], index: 0, kind: input, shape index: {}]   ;;  %s867_s1 = inlined_call_operand.hbm [shape: f32[16,128], index: 1, kind: input, shape index: {}]   ;;  %s868_s2 = inlined_call_operand.hbm [shape: f32[128,128], index: 2, kind: input, shape index: {}]   ;;  %s869_s3 = inlined_call_operand.hbm [shape: f32[128,128], index: 3, kind: input, shape index: {}]   ;;  %s870_s4 = inlined_call_operand.vmem [shape: f32[1,128], index: 4, kind: input, shape index: {}]   ;;  %s871_s5 = inlined_call_operand.vmem [shape: f32[1,128], index: 5, kind: input, shape index: {}]   ;;  %s872_s6 = inlined_call_operand.vmem [shape: f32[1,128], index: 6, kind: input, shape index: {}]   ;;  %s873_s7 = inlined_call_operand.hbm [shape: f32[16,128], index: 7, kind: output, shape index: {}]  }
   0x1   :  { %13 = vsyncpa [#allocation6], 0 }
   0x2   :  { %14 = vsyncpa [#allocation9], 0 }
   0x3   :  { %15 = vsyncpa [#allocation4], 0  ;;  %s719_s24 = smov [#allocation5]   ;;  %s720_s26 = smov [#allocation2]  }
   0x4   :  { %s33_s25 = sshll.u32 %s719_s24, 4  ;;  %s21_s27 = sshll.u32 %s720_s26, 4  ;;  %s34_s25 = int_to_ptr.vmem [resolvable:$true] %s33_s25  ;;  %s766_s27 = int_to_ptr.vmem [resolvable:$true] %s21_s27 }
   0x5   :  { %s601_s30 = scalar_lea.hbm %s867_s1, 256 }
   0x6   :  { %p602_p0 = scmp.ne.s32.totalorder %s867_s1, %s601_s30  ;;  %p605_p1 = scmp.lt.u32.totalorder %s601_s30, %s867_s1 }
   0x8   :  { %p607_p2 = pnand %p605_p1, %p602_p0 }
   0xa   :  { %610 = shalt.err (!%p607_p2)
}
   0xb   :  { %s611_s12 = scalar_lea.vmem %s34_s25, 256  ;;  %p616_p4 = scmp.lt.s32.totalorder %s34_s25, %s34_s25 }
   0xc   :  { %p612_p3 = scmp.ne.s32.totalorder %s34_s25, %s611_s12  ;;  %p617_p5 = scmp.lt.s32.totalorder %s611_s12, %s611_s12 }
   0xe   :  { %p618_p6 = por %p617_p5, %p616_p4 }
  0x10   :  { %p619_p7 = pnand %p618_p6, %p612_p3 }
  0x12   :  { %622 = shalt.err (!%p619_p7)
}
  0x13   :  { %s721_s13 = smov 128   ;;  %s722_s14 = smov 8  }
  0x14   :  { %39 = dma.hbm_to_vmem [thread:$0]  %s867_s1, 256, %s34_s25, [#allocation6], %s721_s13, %s721_s13, %s722_s14  }
  0x15   :  { %s623_s19 = scalar_lea.hbm %s866_s0, 256 }
  0x16   :  { %p624_p8 = scmp.ne.s32.totalorder %s866_s0, %s623_s19  ;;  %p627_p9 = scmp.lt.u32.totalorder %s623_s19, %s866_s0 }
  0x18   :  { %p629_p10 = pnand %p627_p9, %p624_p8 }
  0x1a   :  { %632 = shalt.err (!%p629_p10)
}
  0x1b   :  { %s633_s24 = scalar_lea.vmem %s766_s27, 256  ;;  %p638_p12 = scmp.lt.s32.totalorder %s766_s27, %s766_s27 }
  0x1c   :  { %p634_p11 = scmp.ne.s32.totalorder %s766_s27, %s633_s24  ;;  %p639_p13 = scmp.lt.s32.totalorder %s633_s24, %s633_s24 }
  0x1e   :  { %p640_p0 = por %p639_p13, %p638_p12 }
  0x20   :  { %p641_p1 = pnand %p640_p0, %p634_p11 }
  0x22   :  { %644 = shalt.err (!%p641_p1)
}
  0x23   :  { %27 = dma.hbm_to_vmem [thread:$0]  %s866_s0, 256, %s766_s27, [#allocation3], %s721_s13, %s721_s13, %s722_s14  }
  0x24   :  { %s723_s26 = smov [#allocation7]   ;;  %s724_s29 = smov [#allocation8]  }
  0x25   :  { %s45_s28 = sshll.u32 %s723_s26, 4  ;;  %s57_s30 = sshll.u32 %s724_s29, 4  ;;  %s46_s28 = int_to_ptr.vmem [resolvable:$true] %s45_s28  ;;  %s803_s30 = int_to_ptr.vmem [resolvable:$true] %s57_s30 }
  0x26   :  { %s645_s10 = scalar_lea.hbm %s868_s2, 2048 }
  0x27   :  { %p646_p2 = scmp.ne.s32.totalorder %s868_s2, %s645_s10  ;;  %p649_p3 = scmp.lt.u32.totalorder %s645_s10, %s868_s2 }
  0x29   :  { %p651_p4 = pnand %p649_p3, %p646_p2 }
  0x2b   :  { %654 = shalt.err (!%p651_p4)
}
  0x2c   :  { %s655_s0 = scalar_lea.vmem %s46_s28, 2048  ;;  %p660_p6 = scmp.lt.s32.totalorder %s46_s28, %s46_s28 }
  0x2d   :  { %p656_p5 = scmp.ne.s32.totalorder %s46_s28, %s655_s0  ;;  %p661_p7 = scmp.lt.s32.totalorder %s655_s0, %s655_s0 }
  0x2f   :  { %p662_p8 = por %p661_p7, %p660_p6 }
  0x31   :  { %p663_p9 = pnand %p662_p8, %p656_p5 }
  0x33   :  { %666 = shalt.err (!%p663_p9)
}
  0x34   :  { %51 = dma.hbm_to_vmem [thread:$0]  %s868_s2, 2048, %s46_s28, [#allocation6], %s721_s13, %s721_s13, %s722_s14  }
  0x35   :  { %s667_s20 = scalar_lea.hbm %s869_s3, 2048 }
  0x36   :  { %p668_p10 = scmp.ne.s32.totalorder %s869_s3, %s667_s20  ;;  %p671_p11 = scmp.lt.u32.totalorder %s667_s20, %s869_s3 }
  0x38   :  { %p673_p12 = pnand %p671_p11, %p668_p10 }
  0x3a   :  { %676 = shalt.err (!%p673_p12)
}
  0x3b   :  { %s677_s1 = scalar_lea.vmem %s803_s30, 2048  ;;  %p682_p0 = scmp.lt.s32.totalorder %s803_s30, %s803_s30 }
  0x3c   :  { %p678_p13 = scmp.ne.s32.totalorder %s803_s30, %s677_s1  ;;  %p683_p1 = scmp.lt.s32.totalorder %s677_s1, %s677_s1 }
  0x3e   :  { %p684_p2 = por %p683_p1, %p682_p0 }
  0x40   :  { %p685_p3 = pnand %p684_p2, %p678_p13 }
  0x42   :  { %688 = shalt.err (!%p685_p3)
}
  0x43   :  { %63 = dma.hbm_to_vmem [thread:$0]  %s869_s3, 2048, %s803_s30, [#allocation9], %s721_s13, %s721_s13, %s722_s14  }
  0x44   :  { %711 = dma.done.wait [#allocation3], 256  }
  0x45   :  { %712 = vsyncadd [#allocation3], 4294967040 }
  0x46   :  { %713 = dma.done.wait [#allocation6], 2304  }
  0x47   :  { %714 = vsyncadd [#allocation6], 4294964992 }
  0x48   :  { %715 = dma.done.wait [#allocation9], 2048  }
  0x49   :  { %716 = vsyncadd [#allocation9], 4294965248  ;;  %vm93_vm0 = vcmask 130048   ;;  %v84_v0 = vld [vmem:[#allocation5] sm:$0xff]  ;;  %v85_v1 = vld [vmem:[#allocation5 + $0x8] sm:$0xff]  ;;  %s725_s8 = smov [#allocation10]  }
  0x4a   :  { %v82_v2 = vld [vmem:[#allocation2] sm:$0xff]  ;;  %v518_v3 = vpack.c.bf16 %v85_v1, %v84_v0  ;;  %v178_v5 = vld [vmem:[#allocation7 + $0x8] sm:$0xff]  ;;  %v179_v7 = vld [vmem:[#allocation7 + $0x10] sm:$0xff]  ;;  %s382_s9 = sshll.u32 %s725_s8, 4  ;;  %s383_s9 = int_to_ptr.vmem [resolvable:$true] %s382_s9 }
  0x4b   :  { %445 = vmatprep.mubr.msk.f32.mxu0 %vm93_vm0, %v82_v2  ;;  %v177_v4 = vld [vmem:[#allocation7] sm:$0xff]  ;;  %v180_v8 = vld [vmem:[#allocation7 + $0x18] sm:$0xff]  ;;  %v182_v11 = vld [vmem:[#allocation7 + $0x28] sm:$0xff]  ;;  %p694_p5 = scmp.lt.s32.totalorder %s383_s9, %s383_s9 }
  0x4c   :  { %v522_v6 = vpack.c.bf16 %v178_v5, %v177_v4  ;;  %519 = vmatprep.subr.bf16.mxu0 %v518_v3  ;;  %v526_v9 = vpack.c.bf16 %v180_v8, %v179_v7  ;;  %v181_v10 = vld [vmem:[#allocation7 + $0x20] sm:$0xff]  ;;  %v83_v12 = vld [vmem:[#allocation2 + $0x8] sm:$0xff]  ;;  %v183_v14 = vld [vmem:[#allocation7 + $0x30] sm:$0xff] }
  0x4d   :  { %521 = vmatpush3.bf16.msra.mxu0 %v518_v3  ;;  %v530_v13 = vpack.c.bf16 %v182_v11, %v181_v10  ;;  %v184_v15 = vld [vmem:[#allocation7 + $0x38] sm:$0xff]  ;;  %v185_v17 = vld [vmem:[#allocation7 + $0x40] sm:$0xff]  ;;  %v186_v18 = vld [vmem:[#allocation7 + $0x48] sm:$0xff] }
  0x4e   :  { %523 = vmatprep.subr.bf16.mxu1 %v522_v6  ;;  %v534_v16 = vpack.c.bf16 %v184_v15, %v183_v14  ;;  %v538_v19 = vpack.c.bf16 %v186_v18, %v185_v17  ;;  %v187_v20 = vld [vmem:[#allocation7 + $0x50] sm:$0xff]  ;;  %v188_v21 = vld [vmem:[#allocation7 + $0x58] sm:$0xff]  ;;  %v189_v23 = vld [vmem:[#allocation7 + $0x60] sm:$0xff] }
  0x4f   :  { %525 = vmatpush3.bf16.msra.mxu1 %v522_v6  ;;  %v542_v22 = vpack.c.bf16 %v188_v21, %v187_v20  ;;  %v190_v24 = vld [vmem:[#allocation7 + $0x68] sm:$0xff]  ;;  %v191_v25 = vld [vmem:[#allocation7 + $0x70] sm:$0xff]  ;;  %v192_v27 = vld [vmem:[#allocation7 + $0x78] sm:$0xff] }
  0x50   :  { %527 = vmatprep.subr.bf16.mxu1 %v526_v9  ;;  %446 = vmatmul.mubr.msk.f32.vlgmr.msra.gmra.mrb[0].mxu0 %vm93_vm0, %v83_v12  ;;  %v546_v26 = vpack.c.bf16 %v190_v24, %v189_v23  ;;  %v550_v28 = vpack.c.bf16 %v192_v27, %v191_v25  ;;  %v277_v29 = vld [vmem:[#allocation8] sm:$0xff]  ;;  %v278_v30 = vld [vmem:[#allocation8 + $0x8] sm:$0xff]  ;;  %v279_v31 = vld [vmem:[#allocation8 + $0x10] sm:$0xff] }
  0x51   :  { %v554_v32 = vpack.c.bf16 %v278_v30, %v277_v29  ;;  %v280_v33 = vld [vmem:[#allocation8 + $0x18] sm:$0xff]  ;;  %v281_v35 = vld [vmem:[#allocation8 + $0x20] sm:$0xff]  ;;  %v282_v36 = vld [vmem:[#allocation8 + $0x28] sm:$0xff] }
  0x52   :  { %v558_v34 = vpack.c.bf16 %v280_v33, %v279_v31  ;;  %v562_v37 = vpack.c.bf16 %v282_v36, %v281_v35  ;;  %v283_v38 = vld [vmem:[#allocation8 + $0x30] sm:$0xff]  ;;  %v284_v39 = vld [vmem:[#allocation8 + $0x38] sm:$0xff]  ;;  %v396_v41 = vld [vmem:[%s870_s4] ss:$0 sm:$0xff] }
  0x53   :  { %529 = vmatpush3.bf16.msra.mxu1 %v526_v9  ;;  %555 = vmatprep.subr.bf16.mxu0 %v554_v32  ;;  %v566_v40 = vpack.c.bf16 %v284_v39, %v283_v38  ;;  %v285_v48 = vld [vmem:[#allocation8 + $0x40] sm:$0xff]  ;;  %v286_v49 = vld [vmem:[#allocation8 + $0x48] sm:$0xff]  ;;  %v287_v51 = vld [vmem:[#allocation8 + $0x50] sm:$0xff] }
  0x54   :  { %531 = vmatprep.subr.bf16.mxu1 %v530_v13  ;;  %557 = vmatpush3.bf16.msra.mxu0 %v554_v32  ;;  %v570_v50 = vpack.c.bf16 %v286_v49, %v285_v48  ;;  %v288_v52 = vld [vmem:[#allocation8 + $0x58] sm:$0xff]  ;;  %v289_v54 = vld [vmem:[#allocation8 + $0x60] sm:$0xff]  ;;  %v290_v55 = vld [vmem:[#allocation8 + $0x68] sm:$0xff] }
  0x55   :  { %559 = vmatprep.subr.bf16.mxu0 %v558_v34  ;;  %v574_v53 = vpack.c.bf16 %v288_v52, %v287_v51  ;;  %v291_v56 = vld [vmem:[#allocation8 + $0x70] sm:$0xff]  ;;  %v578_v57 = vpack.c.bf16 %v290_v55, %v289_v54  ;;  %v292_v58 = vld [vmem:[#allocation8 + $0x78] sm:$0xff]  ;;  %v399_v60 = vld [vmem:[%s871_s5] ss:$0 sm:$0xff]  ;;  %s689_s5 = scalar_lea.vmem %s383_s9, 256 }
  0x56   :  { %v582_v59 = vpack.c.bf16 %v292_v58, %v291_v56  ;;  %v400_v3 = vld [vmem:[%s872_s6] ss:$0 sm:$0xff]  ;;  %p690_p4 = scmp.ne.s32.totalorder %s383_s9, %s689_s5  ;;  %p695_p6 = scmp.lt.s32.totalorder %s689_s5, %s689_s5 }
  0x57   :  { %533 = vmatpush3.bf16.msra.mxu1 %v530_v13 }
  0x58   :  { %535 = vmatprep.subr.bf16.mxu1 %v534_v16  ;;  %561 = vmatpush3.bf16.msra.mxu0 %v558_v34  ;;  %p696_p7 = por %p695_p6, %p694_p5 }
  0x59   :  { %563 = vmatprep.subr.bf16.mxu0 %v562_v37 }
  0x5a   :  { %p697_p8 = pnand %p696_p7, %p690_p4 }
  0x5b   :  { %537 = vmatpush3.bf16.msra.mxu1 %v534_v16 }
  0x5c   :  { %539 = vmatprep.subr.bf16.mxu1 %v538_v19  ;;  %565 = vmatpush3.bf16.msra.mxu0 %v562_v37 }
  0x5d   :  { %567 = vmatprep.subr.bf16.mxu0 %v566_v40 }
  0x5f   :  { %541 = vmatpush3.bf16.msra.mxu1 %v538_v19 }
  0x60   :  { %543 = vmatprep.subr.bf16.mxu1 %v542_v22  ;;  %569 = vmatpush3.bf16.msra.mxu0 %v566_v40 }
  0x61   :  { %571 = vmatprep.subr.bf16.mxu0 %v570_v50 }
  0x63   :  { %545 = vmatpush3.bf16.msra.mxu1 %v542_v22 }
  0x64   :  { %547 = vmatprep.subr.bf16.mxu1 %v546_v26  ;;  %573 = vmatpush3.bf16.msra.mxu0 %v570_v50 }
  0x65   :  { %575 = vmatprep.subr.bf16.mxu0 %v574_v53 }
  0x67   :  { %549 = vmatpush3.bf16.msra.mxu1 %v546_v26 }
  0x68   :  { %551 = vmatprep.subr.bf16.mxu1 %v550_v28  ;;  %577 = vmatpush3.bf16.msra.mxu0 %v574_v53 }
  0x69   :  { %579 = vmatprep.subr.bf16.mxu0 %v578_v57 }
  0x6b   :  { %553 = vmatpush3.bf16.msra.mxu1 %v550_v28 }
  0x6c   :  { %581 = vmatpush3.bf16.msra.mxu0 %v578_v57 }
  0x6d   :  { %583 = vmatprep.subr.bf16.mxu0 %v582_v59 }
  0x70   :  { %585 = vmatpush3.bf16.msra.mxu0 %v582_v59 }
 0x123   :  { %v447_v42 = vpop.f32.mrb[0].mxu0 }
 0x124   :  { %v172_v43 = vadd.f32 %v447_v42, %v396_v41  ;;  %v166_v44 = vpop.f32.mrb[1].mxu0 }
 0x125   :  { %v167_v45 = vadd.f32 %v396_v41, %v166_v44 }
 0x127   :  { %593 = vtanh.f32 %v167_v45 }
 0x128   :  { %595 = vtanh.f32 %v172_v43 }
 0x131   :  { %v594_v46 = vpop.eup %593 }
 0x132   :  { %v596_v47 = vpop.eup %595  ;;  %480 = vmatprep.mubr.f32.mxu1 %v594_v46 }
 0x133   :  { %481 = vmatmul.mubr.f32.vlgmr.msra.gmra.mrb[0].mxu1 %v596_v47 }
 0x206   :  { %v482_v61 = vpop.f32.mrb[0].mxu1 }
 0x207   :  { %v272_v62 = vadd.f32 %v482_v61, %v399_v60  ;;  %v266_v63 = vpop.f32.mrb[1].mxu1 }
 0x208   :  { %v267_v0 = vadd.f32 %v399_v60, %v266_v63 }
 0x20a   :  { %597 = vtanh.f32 %v267_v0 }
 0x20b   :  { %599 = vtanh.f32 %v272_v62 }
 0x214   :  { %v598_v1 = vpop.eup %597 }
 0x215   :  { %v600_v2 = vpop.eup %599  ;;  %515 = vmatprep.mubr.f32.mxu0 %v598_v1 }
 0x216   :  { %516 = vmatmul.mubr.f32.vlgmr.msra.gmra.mrb[2].mxu0 %v600_v2 }
 0x2e9   :  { %v517_v4 = vpop.f32.mrb[2].mxu0 }
 0x2ea   :  { %v372_v5 = vadd.f32 %v517_v4, %v400_v3  ;;  %v366_v6 = vpop.f32.mrb[3].mxu0 }
 0x2eb   :  { %v367_v7 = vadd.f32 %v400_v3, %v366_v6 }
 0x2ec   :  { %376 = vst [vmem:[#allocation10 + $0x8] sm:$0xff] %v372_v5 }
 0x2ed   :  { %375 = vst [vmem:[#allocation10] sm:$0xff] %v367_v7 }
 0x2ee   :  { %700 = shalt.err (!%p697_p8)
}
 0x2ef   :  { %s701_s6 = scalar_lea.hbm %s873_s7, 256 }
 0x2f0   :  { %p702_p9 = scmp.ne.s32.totalorder %s873_s7, %s701_s6  ;;  %p705_p10 = scmp.lt.u32.totalorder %s701_s6, %s873_s7 }
 0x2f2   :  { %p707_p11 = pnand %p705_p10, %p702_p9 }
 0x2f4   :  { %710 = shalt.err (!%p707_p11)
}
 0x2f5   :  { %388 = dma.vmem_to_hbm [thread:$0]  %s383_s9, 256, %s873_s7, [#allocation4], %s721_s13, %s721_s13, %s722_s14  }
 0x2f6   :  { %717 = dma.done.wait [#allocation4], 256  }
 0x2f7   :  { %718 = vsyncadd [#allocation4], 4294967040 }
 0x2f8   :  { %392 = vsyncpa [#allocation3], 1 }
 0x2f9   :  { %393 = vsyncpa [#allocation6], 1 }
 0x2fa   :  { %394 = vsyncpa [#allocation9], 1 }
 0x2fb   :  { %395 = vsyncpa [#allocation4], 1 }

// kernel: tpu_custom_call.1
= control target key start
LH: loop header
LB: loop body
LE: loop exit
PB: predicated region body
PF: predicated region fallthrough
CT: control target
= control target key end

     0   :  { %12 = vsyncpa [#allocation3], 0  ;;  %s866_s0 = inlined_call_operand.hbm [shape: f32[16,16], index: 0, kind: input, shape index: {}]   ;;  %s867_s1 = inlined_call_operand.hbm [shape: f32[16,128], index: 1, kind: input, shape index: {}]   ;;  %s868_s2 = inlined_call_operand.hbm [shape: f32[128,128], index: 2, kind: input, shape index: {}]   ;;  %s869_s3 = inlined_call_operand.hbm [shape: f32[128,128], index: 3, kind: input, shape index: {}]   ;;  %s870_s4 = inlined_call_operand.vmem [shape: f32[1,128], index: 4, kind: input, shape index: {}]   ;;  %s871_s5 = inlined_call_operand.vmem [shape: f32[1,128], index: 5, kind: input, shape index: {}]   ;;  %s872_s6 = inlined_call_operand.vmem [shape: f32[1,128], index: 6, kind: input, shape index: {}]   ;;  %s873_s7 = inlined_call_operand.hbm [shape: f32[16,128], index: 7, kind: output, shape index: {}]  }
   0x1   :  { %13 = vsyncpa [#allocation6], 0 }
   0x2   :  { %14 = vsyncpa [#allocation9], 0 }
   0x3   :  { %15 = vsyncpa [#allocation4], 0  ;;  %s719_s24 = smov [#allocation5]   ;;  %s720_s26 = smov [#allocation2]  }
   0x4   :  { %s33_s25 = sshll.u32 %s719_s24, 4  ;;  %s21_s27 = sshll.u32 %s720_s26, 4  ;;  %s34_s25 = int_to_ptr.vmem [resolvable:$true] %s33_s25  ;;  %s766_s27 = int_to_ptr.vmem [resolvable:$true] %s21_s27 }
   0x5   :  { %s601_s30 = scalar_lea.hbm %s867_s1, 256 }
   0x6   :  { %p602_p0 = scmp.ne.s32.totalorder %s867_s1, %s601_s30  ;;  %p605_p1 = scmp.lt.u32.totalorder %s601_s30, %s867_s1 }
   0x8   :  { %p607_p2 = pnand %p605_p1, %p602_p0 }
   0xa   :  { %610 = shalt.err (!%p607_p2)
}
   0xb   :  { %s611_s12 = scalar_lea.vmem %s34_s25, 256  ;;  %p616_p4 = scmp.lt.s32.totalorder %s34_s25, %s34_s25 }
   0xc   :  { %p612_p3 = scmp.ne.s32.totalorder %s34_s25, %s611_s12  ;;  %p617_p5 = scmp.lt.s32.totalorder %s611_s12, %s611_s12 }
   0xe   :  { %p618_p6 = por %p617_p5, %p616_p4 }
  0x10   :  { %p619_p7 = pnand %p618_p6, %p612_p3 }
  0x12   :  { %622 = shalt.err (!%p619_p7)
}
  0x13   :  { %s721_s13 = smov 128   ;;  %s722_s14 = smov 8  }
  0x14   :  { %39 = dma.hbm_to_vmem [thread:$0]  %s867_s1, 256, %s34_s25, [#allocation6], %s721_s13, %s721_s13, %s722_s14  }
  0x15   :  { %s623_s19 = scalar_lea.hbm %s866_s0, 256 }
  0x16   :  { %p624_p8 = scmp.ne.s32.totalorder %s866_s0, %s623_s19  ;;  %p627_p9 = scmp.lt.u32.totalorder %s623_s19, %s866_s0 }
  0x18   :  { %p629_p10 = pnand %p627_p9, %p624_p8 }
  0x1a   :  { %632 = shalt.err (!%p629_p10)
}
  0x1b   :  { %s633_s24 = scalar_lea.vmem %s766_s27, 256  ;;  %p638_p12 = scmp.lt.s32.totalorder %s766_s27, %s766_s27 }
  0x1c   :  { %p634_p11 = scmp.ne.s32.totalorder %s766_s27, %s633_s24  ;;  %p639_p13 = scmp.lt.s32.totalorder %s633_s24, %s633_s24 }
  0x1e   :  { %p640_p0 = por %p639_p13, %p638_p12 }
  0x20   :  { %p641_p1 = pnand %p640_p0, %p634_p11 }
  0x22   :  { %644 = shalt.err (!%p641_p1)
}
  0x23   :  { %27 = dma.hbm_to_vmem [thread:$0]  %s866_s0, 256, %s766_s27, [#allocation3], %s721_s13, %s721_s13, %s722_s14  }
  0x24   :  { %s723_s26 = smov [#allocation7]   ;;  %s724_s29 = smov [#allocation8]  }
  0x25   :  { %s45_s28 = sshll.u32 %s723_s26, 4  ;;  %s57_s30 = sshll.u32 %s724_s29, 4  ;;  %s46_s28 = int_to_ptr.vmem [resolvable:$true] %s45_s28  ;;  %s803_s30 = int_to_ptr.vmem [resolvable:$true] %s57_s30 }
  0x26   :  { %s645_s10 = scalar_lea.hbm %s868_s2, 2048 }
  0x27   :  { %p646_p2 = scmp.ne.s32.totalorder %s868_s2, %s645_s10  ;;  %p649_p3 = scmp.lt.u32.totalorder %s645_s10, %s868_s2 }
  0x29   :  { %p651_p4 = pnand %p649_p3, %p646_p2 }
  0x2b   :  { %654 = shalt.err (!%p651_p4)
}
  0x2c   :  { %s655_s0 = scalar_lea.vmem %s46_s28, 2048  ;;  %p660_p6 = scmp.lt.s32.totalorder %s46_s28, %s46_s28 }
  0x2d   :  { %p656_p5 = scmp.ne.s32.totalorder %s46_s28, %s655_s0  ;;  %p661_p7 = scmp.lt.s32.totalorder %s655_s0, %s655_s0 }
  0x2f   :  { %p662_p8 = por %p661_p7, %p660_p6 }
  0x31   :  { %p663_p9 = pnand %p662_p8, %p656_p5 }
  0x33   :  { %666 = shalt.err (!%p663_p9)
}
  0x34   :  { %51 = dma.hbm_to_vmem [thread:$0]  %s868_s2, 2048, %s46_s28, [#allocation6], %s721_s13, %s721_s13, %s722_s14  }
  0x35   :  { %s667_s20 = scalar_lea.hbm %s869_s3, 2048 }
  0x36   :  { %p668_p10 = scmp.ne.s32.totalorder %s869_s3, %s667_s20  ;;  %p671_p11 = scmp.lt.u32.totalorder %s667_s20, %s869_s3 }
  0x38   :  { %p673_p12 = pnand %p671_p11, %p668_p10 }
  0x3a   :  { %676 = shalt.err (!%p673_p12)
}
  0x3b   :  { %s677_s1 = scalar_lea.vmem %s803_s30, 2048  ;;  %p682_p0 = scmp.lt.s32.totalorder %s803_s30, %s803_s30 }
  0x3c   :  { %p678_p13 = scmp.ne.s32.totalorder %s803_s30, %s677_s1  ;;  %p683_p1 = scmp.lt.s32.totalorder %s677_s1, %s677_s1 }
  0x3e   :  { %p684_p2 = por %p683_p1, %p682_p0 }
  0x40   :  { %p685_p3 = pnand %p684_p2, %p678_p13 }
  0x42   :  { %688 = shalt.err (!%p685_p3)
}
  0x43   :  { %63 = dma.hbm_to_vmem [thread:$0]  %s869_s3, 2048, %s803_s30, [#allocation9], %s721_s13, %s721_s13, %s722_s14  }
  0x44   :  { %711 = dma.done.wait [#allocation3], 256  }
  0x45   :  { %712 = vsyncadd [#allocation3], 4294967040 }
  0x46   :  { %713 = dma.done.wait [#allocation6], 2304  }
  0x47   :  { %714 = vsyncadd [#allocation6], 4294964992 }
  0x48   :  { %715 = dma.done.wait [#allocation9], 2048  }
  0x49   :  { %716 = vsyncadd [#allocation9], 4294965248  ;;  %vm93_vm0 = vcmask 130048   ;;  %v84_v0 = vld [vmem:[#allocation5] sm:$0xff]  ;;  %v85_v1 = vld [vmem:[#allocation5 + $0x8] sm:$0xff]  ;;  %s725_s8 = smov [#allocation10]  }
  0x4a   :  { %v82_v2 = vld [vmem:[#allocation2] sm:$0xff]  ;;  %v518_v3 = vpack.c.bf16 %v85_v1, %v84_v0  ;;  %v178_v5 = vld [vmem:[#allocation7 + $0x8] sm:$0xff]  ;;  %v179_v7 = vld [vmem:[#allocation7 + $0x10] sm:$0xff]  ;;  %s382_s9 = sshll.u32 %s725_s8, 4  ;;  %s383_s9 = int_to_ptr.vmem [resolvable:$true] %s382_s9 }
  0x4b   :  { %445 = vmatprep.mubr.msk.f32.mxu0 %vm93_vm0, %v82_v2  ;;  %v177_v4 = vld [vmem:[#allocation7] sm:$0xff]  ;;  %v180_v8 = vld [vmem:[#allocation7 + $0x18] sm:$0xff]  ;;  %v182_v11 = vld [vmem:[#allocation7 + $0x28] sm:$0xff]  ;;  %p694_p5 = scmp.lt.s32.totalorder %s383_s9, %s383_s9 }
  0x4c   :  { %v522_v6 = vpack.c.bf16 %v178_v5, %v177_v4  ;;  %519 = vmatprep.subr.bf16.mxu0 %v518_v3  ;;  %v526_v9 = vpack.c.bf16 %v180_v8, %v179_v7  ;;  %v181_v10 = vld [vmem:[#allocation7 + $0x20] sm:$0xff]  ;;  %v83_v12 = vld [vmem:[#allocation2 + $0x8] sm:$0xff]  ;;  %v183_v14 = vld [vmem:[#allocation7 + $0x30] sm:$0xff] }
  0x4d   :  { %521 = vmatpush3.bf16.msra.mxu0 %v518_v3  ;;  %v530_v13 = vpack.c.bf16 %v182_v11, %v181_v10  ;;  %v184_v15 = vld [vmem:[#allocation7 + $0x38] sm:$0xff]  ;;  %v185_v17 = vld [vmem:[#allocation7 + $0x40] sm:$0xff]  ;;  %v186_v18 = vld [vmem:[#allocation7 + $0x48] sm:$0xff] }
  0x4e   :  { %523 = vmatprep.subr.bf16.mxu1 %v522_v6  ;;  %v534_v16 = vpack.c.bf16 %v184_v15, %v183_v14  ;;  %v538_v19 = vpack.c.bf16 %v186_v18, %v185_v17  ;;  %v187_v20 = vld [vmem:[#allocation7 + $0x50] sm:$0xff]  ;;  %v188_v21 = vld [vmem:[#allocation7 + $0x58] sm:$0xff]  ;;  %v189_v23 = vld [vmem:[#allocation7 + $0x60] sm:$0xff] }
  0x4f   :  { %525 = vmatpush3.bf16.msra.mxu1 %v522_v6  ;;  %v542_v22 = vpack.c.bf16 %v188_v21, %v187_v20  ;;  %v190_v24 = vld [vmem:[#allocation7 + $0x68] sm:$0xff]  ;;  %v191_v25 = vld [vmem:[#allocation7 + $0x70] sm:$0xff]  ;;  %v192_v27 = vld [vmem:[#allocation7 + $0x78] sm:$0xff] }
  0x50   :  { %527 = vmatprep.subr.bf16.mxu1 %v526_v9  ;;  %446 = vmatmul.mubr.msk.f32.vlgmr.msra.gmra.mrb[0].mxu0 %vm93_vm0, %v83_v12  ;;  %v546_v26 = vpack.c.bf16 %v190_v24, %v189_v23  ;;  %v550_v28 = vpack.c.bf16 %v192_v27, %v191_v25  ;;  %v277_v29 = vld [vmem:[#allocation8] sm:$0xff]  ;;  %v278_v30 = vld [vmem:[#allocation8 + $0x8] sm:$0xff]  ;;  %v279_v31 = vld [vmem:[#allocation8 + $0x10] sm:$0xff] }
  0x51   :  { %v554_v32 = vpack.c.bf16 %v278_v30, %v277_v29  ;;  %v280_v33 = vld [vmem:[#allocation8 + $0x18] sm:$0xff]  ;;  %v281_v35 = vld [vmem:[#allocation8 + $0x20] sm:$0xff]  ;;  %v282_v36 = vld [vmem:[#allocation8 + $0x28] sm:$0xff] }
  0x52   :  { %v558_v34 = vpack.c.bf16 %v280_v33, %v279_v31  ;;  %v562_v37 = vpack.c.bf16 %v282_v36, %v281_v35  ;;  %v283_v38 = vld [vmem:[#allocation8 + $0x30] sm:$0xff]  ;;  %v284_v39 = vld [vmem:[#allocation8 + $0x38] sm:$0xff]  ;;  %v396_v41 = vld [vmem:[%s870_s4] ss:$0 sm:$0xff] }
  0x53   :  { %529 = vmatpush3.bf16.msra.mxu1 %v526_v9  ;;  %555 = vmatprep.subr.bf16.mxu0 %v554_v32  ;;  %v566_v40 = vpack.c.bf16 %v284_v39, %v283_v38  ;;  %v285_v48 = vld [vmem:[#allocation8 + $0x40] sm:$0xff]  ;;  %v286_v49 = vld [vmem:[#allocation8 + $0x48] sm:$0xff]  ;;  %v287_v51 = vld [vmem:[#allocation8 + $0x50] sm:$0xff] }
  0x54   :  { %531 = vmatprep.subr.bf16.mxu1 %v530_v13  ;;  %557 = vmatpush3.bf16.msra.mxu0 %v554_v32  ;;  %v570_v50 = vpack.c.bf16 %v286_v49, %v285_v48  ;;  %v288_v52 = vld [vmem:[#allocation8 + $0x58] sm:$0xff]  ;;  %v289_v54 = vld [vmem:[#allocation8 + $0x60] sm:$0xff]  ;;  %v290_v55 = vld [vmem:[#allocation8 + $0x68] sm:$0xff] }
  0x55   :  { %559 = vmatprep.subr.bf16.mxu0 %v558_v34  ;;  %v574_v53 = vpack.c.bf16 %v288_v52, %v287_v51  ;;  %v291_v56 = vld [vmem:[#allocation8 + $0x70] sm:$0xff]  ;;  %v578_v57 = vpack.c.bf16 %v290_v55, %v289_v54  ;;  %v292_v58 = vld [vmem:[#allocation8 + $0x78] sm:$0xff]  ;;  %v399_v60 = vld [vmem:[%s871_s5] ss:$0 sm:$0xff]  ;;  %s689_s5 = scalar_lea.vmem %s383_s9, 256 }
  0x56   :  { %v582_v59 = vpack.c.bf16 %v292_v58, %v291_v56  ;;  %v400_v3 = vld [vmem:[%s872_s6] ss:$0 sm:$0xff]  ;;  %p690_p4 = scmp.ne.s32.totalorder %s383_s9, %s689_s5  ;;  %p695_p6 = scmp.lt.s32.totalorder %s689_s5, %s689_s5 }
  0x57   :  { %533 = vmatpush3.bf16.msra.mxu1 %v530_v13 }
  0x58   :  { %535 = vmatprep.subr.bf16.mxu1 %v534_v16  ;;  %561 = vmatpush3.bf16.msra.mxu0 %v558_v34  ;;  %p696_p7 = por %p695_p6, %p694_p5 }
  0x59   :  { %563 = vmatprep.subr.bf16.mxu0 %v562_v37 }
  0x5a   :  { %p697_p8 = pnand %p696_p7, %p690_p4 }
  0x5b   :  { %537 = vmatpush3.bf16.msra.mxu1 %v534_v16 }
  0x5c   :  { %539 = vmatprep.subr.bf16.mxu1 %v538_v19  ;;  %565 = vmatpush3.bf16.msra.mxu0 %v562_v37 }
  0x5d   :  { %567 = vmatprep.subr.bf16.mxu0 %v566_v40 }
  0x5f   :  { %541 = vmatpush3.bf16.msra.mxu1 %v538_v19 }
  0x60   :  { %543 = vmatprep.subr.bf16.mxu1 %v542_v22  ;;  %569 = vmatpush3.bf16.msra.mxu0 %v566_v40 }
  0x61   :  { %571 = vmatprep.subr.bf16.mxu0 %v570_v50 }
  0x63   :  { %545 = vmatpush3.bf16.msra.mxu1 %v542_v22 }
  0x64   :  { %547 = vmatprep.subr.bf16.mxu1 %v546_v26  ;;  %573 = vmatpush3.bf16.msra.mxu0 %v570_v50 }
  0x65   :  { %575 = vmatprep.subr.bf16.mxu0 %v574_v53 }
  0x67   :  { %549 = vmatpush3.bf16.msra.mxu1 %v546_v26 }
  0x68   :  { %551 = vmatprep.subr.bf16.mxu1 %v550_v28  ;;  %577 = vmatpush3.bf16.msra.mxu0 %v574_v53 }
  0x69   :  { %579 = vmatprep.subr.bf16.mxu0 %v578_v57 }
  0x6b   :  { %553 = vmatpush3.bf16.msra.mxu1 %v550_v28 }
  0x6c   :  { %581 = vmatpush3.bf16.msra.mxu0 %v578_v57 }
  0x6d   :  { %583 = vmatprep.subr.bf16.mxu0 %v582_v59 }
  0x70   :  { %585 = vmatpush3.bf16.msra.mxu0 %v582_v59 }
 0x123   :  { %v447_v42 = vpop.f32.mrb[0].mxu0 }
 0x124   :  { %v172_v43 = vadd.f32 %v447_v42, %v396_v41  ;;  %v166_v44 = vpop.f32.mrb[1].mxu0 }
 0x125   :  { %v167_v45 = vadd.f32 %v396_v41, %v166_v44 }
 0x127   :  { %593 = vtanh.f32 %v167_v45 }
 0x128   :  { %595 = vtanh.f32 %v172_v43 }
 0x131   :  { %v594_v46 = vpop.eup %593 }
 0x132   :  { %v596_v47 = vpop.eup %595  ;;  %480 = vmatprep.mubr.f32.mxu1 %v594_v46 }
 0x133   :  { %481 = vmatmul.mubr.f32.vlgmr.msra.gmra.mrb[0].mxu1 %v596_v47 }
 0x206   :  { %v482_v61 = vpop.f32.mrb[0].mxu1 }
 0x207   :  { %v272_v62 = vadd.f32 %v482_v61, %v399_v60  ;;  %v266_v63 = vpop.f32.mrb[1].mxu1 }
 0x208   :  { %v267_v0 = vadd.f32 %v399_v60, %v266_v63 }
 0x20a   :  { %597 = vtanh.f32 %v267_v0 }
 0x20b   :  { %599 = vtanh.f32 %v272_v62 }
 0x214   :  { %v598_v1 = vpop.eup %597 }
 0x215   :  { %v600_v2 = vpop.eup %599  ;;  %515 = vmatprep.mubr.f32.mxu0 %v598_v1 }
 0x216   :  { %516 = vmatmul.mubr.f32.vlgmr.msra.gmra.mrb[2].mxu0 %v600_v2 }
 0x2e9   :  { %v517_v4 = vpop.f32.mrb[2].mxu0 }
 0x2ea   :  { %v372_v5 = vadd.f32 %v517_v4, %v400_v3  ;;  %v366_v6 = vpop.f32.mrb[3].mxu0 }
 0x2eb   :  { %v367_v7 = vadd.f32 %v400_v3, %v366_v6 }
 0x2ec   :  { %376 = vst [vmem:[#allocation10 + $0x8] sm:$0xff] %v372_v5 }
 0x2ed   :  { %375 = vst [vmem:[#allocation10] sm:$0xff] %v367_v7 }
 0x2ee   :  { %700 = shalt.err (!%p697_p8)
}
 0x2ef   :  { %s701_s6 = scalar_lea.hbm %s873_s7, 256 }
 0x2f0   :  { %p702_p9 = scmp.ne.s32.totalorder %s873_s7, %s701_s6  ;;  %p705_p10 = scmp.lt.u32.totalorder %s701_s6, %s873_s7 }
 0x2f2   :  { %p707_p11 = pnand %p705_p10, %p702_p9 }
 0x2f4   :  { %710 = shalt.err (!%p707_p11)
}
 0x2f5   :  { %388 = dma.vmem_to_hbm [thread:$0]  %s383_s9, 256, %s873_s7, [#allocation4], %s721_s13, %s721_s13, %s722_s14  }
 0x2f6   :  { %717 = dma.done.wait [#allocation4], 256  }
 0x2f7   :  { %718 = vsyncadd [#allocation4], 4294967040 }
 0x2f8   :  { %392 = vsyncpa [#allocation3], 1 }
 0x2f9   :  { %393 = vsyncpa [#allocation6], 1 }
 0x2fa   :  { %394 = vsyncpa [#allocation9], 1 }
 0x2fb   :  { %395 = vsyncpa [#allocation4], 1 }

</bundles_post_ra>
